<compile_context>
chip_gen: v6e
topology: v6e:2x2x1
jax: 0.10.0
libtpu: 0.0.40
codegen_flags: <defaults>
</compile_context>

<pallas_src>
import functools

import jax
import jax.numpy as jnp
from jax import lax
from jax.experimental import pallas as pl
from jax.experimental.pallas import tpu as pltpu


def _round_up(x, m):
    return ((x + m - 1) // m) * m


def _vmem_budgets():
    """(explicit working-set budget, vmem_limit_bytes) per TPU generation."""
    try:
        cap = int(pltpu.get_tpu_info().vmem_capacity_bytes)
    except Exception:
        cap = 64 * 1024 * 1024          # conservative fallback (v7x physical)
    work_budget = min(24 * 1024 * 1024, cap // 4)      # v6e: 24 MiB, v7x: 16 MiB
    vmem_limit = min(64 * 1024 * 1024, max(32 * 1024 * 1024, cap // 2))
    return work_budget, vmem_limit


def _focal_kernel(logits_ref, tgt_ref, out_ref, *, gamma, beta, n_rows,
                  tile_n, reduction, scale):
    x = logits_ref[...].astype(jnp.float32)          # (tile_n, C)
    t = tgt_ref[...]                                  # (tile_n, 1) int32

    # Numerically stable logsumexp along the class (lane) axis.
    m = jnp.max(x, axis=-1, keepdims=True)
    z = x - m
    lse = jnp.log(jnp.sum(jnp.exp(z), axis=-1, keepdims=True))

    # ce = lse - z[target]; one-hot masked sum instead of a dynamic gather and
    # no full (tile_n, C) log-softmax temporary.
    col = lax.broadcasted_iota(jnp.int32, z.shape, 1)
    z_t = jnp.sum(jnp.where(col == t, z, 0.0), axis=-1, keepdims=True)
    ce = lse - z_t                                    # (tile_n, 1)

    # focal modulation (1 - exp(-ce))**gamma; clamp so rounding can never make
    # the base negative (NaN via pow for fractional gamma).
    one_minus_p = jnp.maximum(1.0 - jnp.exp(-ce), 0.0)
    if gamma == 0.0:
        loss = ce
    elif float(gamma).is_integer() and int(gamma) <= 8:
        # Integer gamma: repeated VPU multiplies instead of EUP exp/log pow.
        mod = one_minus_p
        for _ in range(int(gamma) - 1):
            mod = mod * one_minus_p
        loss = mod * ce
    else:
        loss = one_minus_p ** gamma * ce              # (tile_n, 1)

    if reduction == 'none':
        if beta != 1.0:
            loss = loss * beta                        # beta folded in-kernel
        # Ragged boundary blocks: OOB output rows are dropped by Pallas.
        out_ref[...] = loss
    else:
        # Per-tile partial sum; select-mask out boundary rows (garbage reads
        # on the ragged last block never reach the sum, NaN-safe).
        i = pl.program_id(0)
        row = i * tile_n + lax.broadcasted_iota(jnp.int32, loss.shape, 0)
        tile_sum = jnp.sum(jnp.where(row < n_rows, loss, 0.0)) * scale
        r = lax.broadcasted_iota(jnp.int32, (8, 128), 0)
        c = lax.broadcasted_iota(jnp.int32, (8, 128), 1)
        out_ref[...] = jnp.where((r == 0) & (c == 0), tile_sum, 0.0)


def focal_loss_tpu(logits, target, *, gamma=0.0, beta=1.0, reduction='mean',
                   tile_n=None):
    """Equivalent of FocalLoss(gamma, beta, reduction)(logits, target)."""
    assert gamma >= 0
    if reduction not in ('none', 'mean', 'sum'):
        raise ValueError("Invalid reduction option. Use 'none', 'mean', or 'sum'.")

    n, c = logits.shape
    itemsize = int(jnp.dtype(logits.dtype).itemsize)
    work_budget, vmem_limit = _vmem_budgets()

    if tile_n is None:
        # Per-row working set: double-buffered native-dtype input block plus
        # ~4 f32 (tile_n, C) temporaries (x_f32, z, exp(z), one-hot select).
        row_bytes = 2 * c * itemsize + 4 * c * 4
        tile_n = work_budget // row_bytes
        tile_n = max(8, min(8192, (tile_n // 8) * 8))
        # Ensure >= 2 tiles so the "parallel" axis can use both TCs on v7x.
        two_tile_cap = max(8, _round_up((n + 1) // 2, 8))
        tile_n = min(tile_n, two_tile_cap)
    tile_n = int(max(8, min(_round_up(int(tile_n), 8), _round_up(n, 8))))

    num_tiles = (n + tile_n - 1) // tile_n
    tgt = target.astype(jnp.int32).reshape(n, 1)

    if reduction == 'none':
        out_shape = jax.ShapeDtypeStruct((n, 1), jnp.float32)
        out_spec = pl.BlockSpec((tile_n, 1), lambda i: (i, 0))
        scale = 1.0
    else:
        # One (8,128)-aligned block per tile keeps the batch axis "parallel"
        # (no cross-tile accumulation inside the kernel).
        out_shape = jax.ShapeDtypeStruct((8, num_tiles * 128), jnp.float32)
        out_spec = pl.BlockSpec((8, 128), lambda i: (0, i))
        scale = float(beta) / float(n) if reduction == 'mean' else float(beta)

    out_bytes = out_shape.shape[0] * out_shape.shape[1] * 4
    trans = n * c + 2 * n
    if gamma != 0.0 and not float(gamma).is_integer():
        trans += 2 * n                               # pow = exp(gamma*log(x))
    cost = pl.CostEstimate(
        flops=6 * n * c,
        transcendentals=trans,
        bytes_accessed=n * c * itemsize + n * 4 + out_bytes,
    )

    kernel = functools.partial(
        _focal_kernel, gamma=float(gamma), beta=float(beta), n_rows=n,
        tile_n=tile_n, reduction=reduction, scale=scale)

    out = pl.pallas_call(
        kernel,
        out_shape=out_shape,
        grid=(num_tiles,),
        in_specs=[
            pl.BlockSpec((tile_n, c), lambda i: (i, 0)),   # logits, native dtype
            pl.BlockSpec((tile_n, 1), lambda i: (i, 0)),   # targets (int32)
        ],
        out_specs=out_spec,
        compiler_params=pltpu.CompilerParams(
            dimension_semantics=("parallel",),
            vmem_limit_bytes=vmem_limit,
        ),
        cost_estimate=cost,
    )(logits, tgt)

    if reduction == 'none':
        return out[:, 0]                 # beta already folded in-kernel
    return jnp.sum(out)                  # beta (and 1/N for 'mean') folded in


def _focal_loss_ref(logits, target, *, gamma=0.0, beta=1.0, reduction='mean'):
    logp = jax.nn.log_softmax(logits.astype(jnp.float32), axis=-1)
    ce = -jnp.take_along_axis(logp, target.astype(jnp.int32)[:, None], axis=-1)[:, 0]
    p = jnp.exp(-ce)
    loss = (1.0 - p) ** gamma * ce
    if reduction == 'none':
        return beta * loss
    if reduction == 'mean':
        return beta * jnp.mean(loss)
    return beta * jnp.sum(loss)


if __name__ == "__main__":
    key = jax.random.PRNGKey(0)
    k_logits, k_tgt = jax.random.split(key)

    N, C = 20, 32
    logits = jax.random.normal(k_logits, (N, C), dtype=jnp.float32)
    target = jax.random.randint(k_tgt, (N,), 0, C, dtype=jnp.int32)

    gamma, beta = 2.0, 1.0

    # Multi-tile + ragged-boundary path (tile_n=8 -> 3 tiles over 20 rows,
    # last block ragged, no wrapper-side padding).
    for reduction in ('mean', 'sum', 'none'):
        out = focal_loss_tpu(logits, target, gamma=gamma, beta=beta,
                             reduction=reduction, tile_n=8)
        out = jax.block_until_ready(out)
        ref = _focal_loss_ref(logits, target, gamma=gamma, beta=beta,
                              reduction=reduction)
        assert jnp.allclose(out, ref, rtol=1e-5, atol=1e-5), (reduction, out, ref)

    # Auto-tiled path (two ragged tiles) with fractional gamma and beta != 1.
    for reduction in ('mean', 'none'):
        out = focal_loss_tpu(logits, target, gamma=0.5, beta=2.0,
                             reduction=reduction)
        out = jax.block_until_ready(out)
        ref = _focal_loss_ref(logits, target, gamma=0.5, beta=2.0,
                              reduction=reduction)
        assert jnp.allclose(out, ref, rtol=1e-5, atol=1e-5), (reduction, out, ref)

    print("KERNEL_OK")
</pallas_src>

<mosaic_0001>
module attributes {stable_mosaic.version = 11 : i64} {
  func.func @_focal_kernel(%arg0: i32, %arg1: memref<8x32xf32, #tpu.memory_space<vmem>>, %arg2: memref<8x1xi32, #tpu.memory_space<vmem>>, %arg3: memref<8x128xf32, #tpu.memory_space<vmem>>) attributes {dimension_semantics = [#tpu.dimension_semantics<parallel>], iteration_bounds = array<i64: 3>, scalar_prefetch = 0 : i64, scratch_operands = 0 : i64, tpu.core_type = #tpu.core_type<tc>, window_params = [{transform_indices = @transform_0, window_bounds = array<i64: 8, 32>}, {transform_indices = @transform_1, window_bounds = array<i64: 8, 1>}, {transform_indices = @transform_2, window_bounds = array<i64: 8, 128>}]} {
    %c0 = arith.constant 0 : index
    %c0_0 = arith.constant 0 : index
    %0 = vector.load %arg1[%c0, %c0_0] : memref<8x32xf32, #tpu.memory_space<vmem>>, vector<8x32xf32>
    %c0_1 = arith.constant 0 : index
    %c0_2 = arith.constant 0 : index
    %1 = vector.load %arg2[%c0_1, %c0_2] : memref<8x1xi32, #tpu.memory_space<vmem>>, vector<8x1xi32>
    %cst = arith.constant dense<0xFF800000> : vector<8xf32>
    %2 = vector.multi_reduction <maximumf>, %0, %cst [1] : vector<8x32xf32> to vector<8xf32>
    %3 = vector.shape_cast %2 : vector<8xf32> to vector<8x1xf32>
    %4 = vector.broadcast %3 : vector<8x1xf32> to vector<8x32xf32>
    %5 = arith.subf %0, %4 : vector<8x32xf32>
    %6 = math.exp %5 : vector<8x32xf32>
    %cst_3 = arith.constant dense<0.000000e+00> : vector<8xf32>
    %7 = vector.multi_reduction <add>, %6, %cst_3 [1] : vector<8x32xf32> to vector<8xf32>
    %8 = vector.shape_cast %7 : vector<8xf32> to vector<8x1xf32>
    %9 = math.log %8 : vector<8x1xf32>
    %10 = tpu.iota {dimensions = array<i32: 1>} : vector<8x32xi32>
    %11 = vector.broadcast %1 : vector<8x1xi32> to vector<8x32xi32>
    %12 = arith.cmpi eq, %10, %11 : vector<8x32xi32>
    %cst_4 = arith.constant 0.000000e+00 : f32
    %13 = vector.broadcast %cst_4 : f32 to vector<8x32xf32>
    %14 = arith.select %12, %5, %13 : vector<8x32xi1>, vector<8x32xf32>
    %cst_5 = arith.constant dense<0.000000e+00> : vector<8xf32>
    %15 = vector.multi_reduction <add>, %14, %cst_5 [1] : vector<8x32xf32> to vector<8xf32>
    %16 = vector.shape_cast %15 : vector<8xf32> to vector<8x1xf32>
    %17 = arith.subf %9, %16 : vector<8x1xf32>
    %cst_6 = arith.constant 0.000000e+00 : f32
    %18 = vector.broadcast %cst_6 : f32 to vector<8x1xf32>
    %19 = arith.subf %18, %17 : vector<8x1xf32>
    %20 = math.exp %19 : vector<8x1xf32>
    %cst_7 = arith.constant 1.000000e+00 : f32
    %21 = vector.broadcast %cst_7 : f32 to vector<8x1xf32>
    %22 = arith.subf %21, %20 : vector<8x1xf32>
    %cst_8 = arith.constant 0.000000e+00 : f32
    %23 = vector.broadcast %cst_8 : f32 to vector<8x1xf32>
    %24 = arith.maximumf %22, %23 : vector<8x1xf32>
    %25 = arith.mulf %24, %24 : vector<8x1xf32>
    %26 = arith.mulf %25, %17 : vector<8x1xf32>
    %c8_i32 = arith.constant 8 : i32
    %27 = arith.muli %arg0, %c8_i32 : i32
    %28 = tpu.iota {dimensions = array<i32: 0>} : vector<8x1xi32>
    %29 = vector.broadcast %27 : i32 to vector<8x1xi32>
    %30 = arith.addi %29, %28 : vector<8x1xi32>
    %c20_i32 = arith.constant 20 : i32
    %31 = vector.broadcast %c20_i32 : i32 to vector<8x1xi32>
    %32 = arith.cmpi slt, %30, %31 : vector<8x1xi32>
    %cst_9 = arith.constant 0.000000e+00 : f32
    %33 = vector.broadcast %cst_9 : f32 to vector<8x1xf32>
    %34 = arith.select %32, %26, %33 : vector<8x1xi1>, vector<8x1xf32>
    %35 = vector.shape_cast %34 : vector<8x1xf32> to vector<1x8x1xf32>
    %cst_10 = arith.constant dense<0.000000e+00> : vector<1xf32>
    %36 = vector.multi_reduction <add>, %35, %cst_10 [1, 2] : vector<1x8x1xf32> to vector<1xf32>
    %37 = vector.shape_cast %36 : vector<1xf32> to vector<1x1x1xf32>
    %38 = vector.extract %37[0, 0, 0] : f32 from vector<1x1x1xf32>
    %cst_11 = arith.constant 5.000000e-02 : f32
    %39 = arith.mulf %38, %cst_11 : f32
    %40 = tpu.iota {dimensions = array<i32: 0>} : vector<8x128xi32>
    %41 = tpu.iota {dimensions = array<i32: 1>} : vector<8x128xi32>
    %c0_i32 = arith.constant 0 : i32
    %42 = vector.broadcast %c0_i32 : i32 to vector<8x128xi32>
    %43 = arith.cmpi eq, %40, %42 : vector<8x128xi32>
    %c0_i32_12 = arith.constant 0 : i32
    %44 = vector.broadcast %c0_i32_12 : i32 to vector<8x128xi32>
    %45 = arith.cmpi eq, %41, %44 : vector<8x128xi32>
    %46 = arith.andi %43, %45 : vector<8x128xi1>
    %cst_13 = arith.constant 0.000000e+00 : f32
    %47 = vector.broadcast %39 : f32 to vector<8x128xf32>
    %48 = vector.broadcast %cst_13 : f32 to vector<8x128xf32>
    %49 = arith.select %46, %47, %48 : vector<8x128xi1>, vector<8x128xf32>
    %c0_14 = arith.constant 0 : index
    %c0_15 = arith.constant 0 : index
    %50 = vector.load %arg3[%c0_14, %c0_15] : memref<8x128xf32, #tpu.memory_space<vmem>>, vector<8x128xf32>
    tpu.vector_store %arg3[%c0_14, %c0_15], %49 {strides = array<i32>} : memref<8x128xf32, #tpu.memory_space<vmem>>, vector<8x128xf32>,
    return
  }
  func.func @transform_0(%arg0: i32) -> (i32, i32) {
    %c0_i32 = arith.constant 0 : i32
    %c0_i32_0 = arith.constant 0 : i32
    return %arg0, %c0_i32 : i32, i32
  }
  func.func @transform_1(%arg0: i32) -> (i32, i32) {
    %c0_i32 = arith.constant 0 : i32
    %c0_i32_0 = arith.constant 0 : i32
    return %arg0, %c0_i32 : i32, i32
  }
  func.func @transform_2(%arg0: i32) -> (i32, i32) {
    %c0_i32 = arith.constant 0 : i32
    %c0_i32_0 = arith.constant 0 : i32
    return %c0_i32, %arg0 : i32, i32
  }
}

</mosaic_0001>

<bundles_post_ra>
// kernel: tpu_custom_call.1
= control target key start
LH: loop header
LB: loop body
LE: loop exit
PB: predicated region body
PF: predicated region fallthrough
CT: control target
= control target key end

     0   :  { %7 = vsyncpa [#allocation3], 0  ;;  %s538_s0 = inlined_call_operand.vmem [shape: f32[20,32], index: 0, kind: input, shape index: {}]   ;;  %s539_s1 = inlined_call_operand.vmem [shape: s32[20,1], index: 1, kind: input, shape index: {}]   ;;  %s540_s2 = inlined_call_operand.hbm [shape: f32[8,384], index: 2, kind: output, shape index: {}]  }
   0x1   :  { %9 = vsyncpa [#allocation3 + $0x1], 0  ;;  %s438_s9 = smov 0   ;;  %s440_s10 = smov 0  }
   0x2   :  { %s442_s11 = smov 0   ;;  %s444_s12 = smov 0  }
   0x3 LB: > { %s459_s13 = sadd.s32 4294967295, %s419_s12   ;;  %s298_s14 = sadd.s32 4294967294, %s419_s12   ;;  %s419_s12 = sphi %s444_s12, %s546_s12   ;;  %s415_s11 = sphi %s442_s11, %s545_s11   ;;  %s411_s10 = sphi %s440_s10, %s544_s10   ;;  %s407_s9 = sphi %s438_s9, %s543_s9  }
   0x4   : > { %s463_s15 = sadd.s32 1, %s419_s12   ;;  %s74_s16 = sadd.s32 1, %s415_s11 }
   0x5   : > { %s71_s17 = ssub.s32 %s419_s12, %s463_s15  ;;  %p84_p0 = scmp.ne.s32.totalorder %s415_s11, %s411_s10 }
   0x6   : > { %p72_p1 = scmp.eq.s32.totalorder %s71_s17, 0  ;;  %p85_p2 = scmp.eq.s32.totalorder %s459_s13, 2 }
   0x7   : > { %p90_p3 = scmp.ne.s32.totalorder %s411_s10, %s407_s9  ;;  %p91_p4 = scmp.eq.s32.totalorder %s298_s14, 2 }
   0x8   : > { %s474_s18 = scalar_select %p72_p1, %s415_s11, %s74_s16  }
   0x9   : > { %p476_p5 = por %p85_p2, %p84_p0  ;;  %p480_p6 = por %p91_p4, %p90_p3 }
   0xa   : > { %p301_p7 = scmp.ge.s32.totalorder %s419_s12, 1  ;;  %p123_p8 = scmp.lt.s32.totalorder %s419_s12, 4 }
   0xc   : > { %p124_p9 = pnand %p301_p7, %p123_p8 }
   0xd   : > { %p148_p10 = scmp.lt.s32.totalorder (!%p124_p9), %s459_s13, 2  ;;  %s305_s29 = sshll.u32 (!%p124_p9), %s459_s13, 3 }
   0xe   : > { %127 = sbr.rel (%p124_p9) target bundleno = 583 (0x247), region = 28  ;;  %s145_s30 = sand.u32 (!%p124_p9), 1, %s411_s10  }
   0xf   : > { %s302_s3 = sshll.u32 (!%p124_p9), %s145_s30, 3  ;;  %s307_s4 = sshll.u32 (!%p124_p9), %s459_s13, 7 }
  0x10   : > { %s147_s6 = scalar_lea.vmem (!%p124_p9), [#allocation2], %s302_s3  ;;  %s503_s17 = scalar_lea.hbm (!%p124_p9), %s540_s2, %s307_s4 }
  0x11   : > { %s227_s7 = sshll.u32 (!%p124_p9), %s147_s6, 4  ;;  %s228_s7 = int_to_ptr.vmem [resolvable:$true] %s227_s7 }
  0x13   : > { %v421_v0 = vmov 0   ;;  %s149_s21 = scalar_select %p148_p10, %s459_s13, 2  ;;  %vm158_vm0 = vcmask 261120   ;;  %v170_v7 = vlaneseq  ;;  %v191_v22 = vstv %s305_s29 }
  0x14   : > { %352 = vset.pattern.permute.xlu0 %v421_v0  ;;  %vm195_vm3 = vcmask 7168   ;;  %s422_s13 = smov [#allocation2]  }
  0x15   : > { %s303_s22 = sshll.u32 %s149_s21, 3  ;;  %v171_v8 = vand.u32 127, %v170_v7  ;;  %v190_v21 = vshrl.u32 %v170_v7, 7  ;;  %s214_s21 = scalar_lea.sflag [#allocation3], %s145_s30 }
  0x16   : > { %s151_s25 = scalar_lea.vmem %s538_s0, %s303_s22  ;;  %s155_s28 = scalar_lea.vmem %s539_s1, %s303_s22 }
  0x17   : > { %v156_v1 = vld [vmem:[%s151_s25] sm:$0xff]  ;;  %v192_v25 = vadd.s32 %v191_v22, %v190_v21  ;;  %vm207_vm4 = vcmp.eq.s32.totalorder %v190_v21, 0  ;;  %vm208_vm5 = vcmp.eq.s32.totalorder %v171_v8, 0  ;;  %s359_s22 = scalar_lea.vmem %s228_s7, 128  ;;  %s363_s23 = sshll.u32 %s422_s13, 4  ;;  %s364_s23 = int_to_ptr.vmem [resolvable:$false] %s363_s23 }
  0x18   : > { %v159_v2 = vsel %vm158_vm0, %v156_v1, -inf  ;;  %v157_v3 = vld [vmem:[%s155_s28] sm:$0xff]  ;;  %vm209_vm6 = vmand %vm207_vm4, %vm208_vm5  ;;  %p360_p11 = scmp.ne.s32.totalorder %s228_s7, %s359_s22  ;;  %s365_s24 = scalar_lea.vmem %s364_s23, 256 }
  0x19   : > { %160 = vmax.xlane.f32.xlu0 %v159_v2  ;;  %vm193_vm2 = vcmp.lt.s32.totalorder %v192_v25, 20  ;;  %p366_p0 = scmp.lt.s32.totalorder %s228_s7, %s364_s23  ;;  %p367_p1 = scmp.lt.s32.totalorder %s365_s24, %s359_s22 }
  0x1a   : > { %p361_p12 = pnand %p360_p11, %p476_p5 }
  0x1b   : > { %p368_p2 = por %p367_p1, %p366_p0 }
  0x1c   : > { %p362_p13 = pneg %p361_p12 }
  0x1e   : > { %p369_p3 = pnand %p368_p2, %p362_p13 }
  0x2f   : > { %173 = vperm.xlu0 %352, %v157_v3  }
  0xa2   : > { %v161_v4 = vpop.xlane.xlu0 %160 }
  0xa3   : > { %v162_v5 = vsub.f32 %v156_v1, %v161_v4 }
  0xa5   : > { %v163_v6 = vmul.f32 1.442695, %v162_v5 }
  0xa7   : > { %353 = vpow2.f32 %v163_v6 }
  0xaa   : > { %v174_v9 = vpop.permute.xlu0 %173 }
  0xab   : > { %vm175_vm1 = vcmp.eq.s32.totalorder %v171_v8, %v174_v9 }
  0xac   : > { %v176_v12 = vsel %vm175_vm1, %v162_v5, 0.0 }
  0xad   : > { %v177_v13 = vsel %vm158_vm0, %v176_v12, 0.0 }
  0xb4   : > { %v354_v10 = vpop.eup %353 }
  0xb5   : > { %v165_v11 = vsel %vm158_vm0, %v354_v10, 0.0 }
  0xb6   : > { %166 = vadd.xlane.f32.xlu1 %v165_v11 }
  0xba   : > { %178 = vadd.xlane.f32.xlu1 %v177_v13 }
 0x13f   : > { %v167_v14 = vpop.xlane.xlu1 %166 }
 0x140   : > { %355 = vlog2.f32 %v167_v14 }
 0x143   : > { %v179_v17 = vpop.xlane.xlu1 %178 }
 0x14d   : > { %v356_v15 = vpop.eup %355 }
 0x14e   : > { %v169_v16 = vmul.f32 0.6931472, %v356_v15 }
 0x150   : > { %v180_v18 = vsub.f32 %v169_v16, %v179_v17 }
 0x152   : > { %v181_v19 = vsub.f32 0.0, %v180_v18 }
 0x154   : > { %v182_v20 = vmul.f32 1.442695, %v181_v19 }
 0x156   : > { %357 = vpow2.f32 %v182_v20 }
 0x163   : > { %v358_v23 = vpop.eup %357 }
 0x164   : > { %v184_v24 = vsub.f32 1.0, %v358_v23 }
 0x166   : > { %v185_v26 = vmax.f32 %v184_v24, 0.0 }
 0x168   : > { %v186_v27 = vmul.f32 %v185_v26, %v185_v26 }
 0x16a   : > { %v187_v28 = vmul.f32 %v186_v27, %v180_v18 }
 0x16c   : > { %v194_v29 = vsel %vm193_vm2, %v187_v28, 0.0 }
 0x16d   : > { %v196_v30 = vsel %vm195_vm3, %v194_v29, 0.0 }
 0x16e   : > { %197 = vadd.xlane.f32.xlu1 %v196_v30 }
 0x1f7   : > { %v198_v31 = vpop.xlane.xlu1 %197 }
 0x1f8   : > { %v199_v32 = vrot.slane %v198_v31, 4 }
 0x1fa   : > { %v200_v33 = vadd.f32 %v199_v32, %v198_v31 }
 0x1fc   : > { %v201_v34 = vrot.slane %v200_v33, 2 }
 0x1fe   : > { %v202_v35 = vadd.f32 %v201_v34, %v200_v33 }
 0x200   : > { %v203_v36 = vrot.slane %v202_v35, 1 }
 0x202   : > { %v204_v37 = vadd.f32 %v203_v36, %v202_v35 }
 0x204   : > { %310 = vpush %v204_v37 }
 0x235   : > { %s311_s5 = spop %310 }
 0x236   : > { %s206_s8 = smul.f32 0.05, %s311_s5 }
 0x238   : > { %v210_v38 = vstv %s206_s8 }
 0x239   : > { %v211_v39 = vsel %vm209_vm6, %v210_v38, 0.0 }
 0x23a   : > { %212 = vst [vmem:[%s147_s6] sm:$0xff] %v211_v39 }
 0x23b   : > { %372 = shalt.err (!%p369_p3)
}
 0x23c   : > { %s373_s25 = scalar_lea.hbm %s503_s17, 128  ;;  %s377_s28 = scalar_lea.hbm %s540_s2, 384 }
 0x23d   : > { %p374_p4 = scmp.ne.s32.totalorder %s503_s17, %s373_s25  ;;  %p378_p9 = scmp.lt.s32.totalorder %s503_s17, %s540_s2 }
 0x23e   : > { %p379_p10 = scmp.lt.s32.totalorder %s377_s28, %s373_s25 }
 0x23f   : > { %p375_p7 = pnand %p374_p4, %p476_p5 }
 0x240   : > { %p380_p11 = por %p379_p10, %p378_p9 }
 0x241   : > { %p376_p8 = pneg %p375_p7 }
 0x243   : > { %p381_p12 = pnand %p380_p11, %p376_p8 }
 0x245   : > { %384 = shalt.err (!%p381_p12)
}
 0x246   : > { %312 = dma.vmem_to_hbm [thread:$0]  (%p476_p5), %s228_s7, 128, %s503_s17, %s214_s21  }
 0x247 PF: > { %p318_p13 = scmp.ge.s32.totalorder %s419_s12, 2  ;;  %s239_s3 = sand.u32 1, %s407_s9  }
 0x248   : > { %s240_s4 = scalar_lea.sflag [#allocation3], %s239_s3 }
 0x249   : > { %p315_p0 = pnand %p318_p13, %p480_p6 }
 0x24b   : > { %p316_p1 = pneg %p315_p0 }
 0x24d   : > { %402 = dma.done.wait (%p316_p1), %s240_s4, 128  }
 0x24e   : > { %404 = vsyncadd (%p316_p1), %s240_s4, 4294967168  ;;  %p12_p2 = scmp.ge.s32.totalorder %s463_s15, 5   ;;  %s543_s9 = smov %s411_s10 }
 0x24f   : > { %s544_s10 = smov %s415_s11  ;;  %s545_s11 = smov %s474_s18 }
 0x250   : > { %s546_s12 = smov %s463_s15  ;;  %14 = sbr.rel (!%p12_p2) target bundleno = 3 (0x3), region = 66 }
 0x255   :  { %245 = vsyncpa [#allocation3], 1 }
 0x256   :  { %247 = vsyncpa [#allocation3 + $0x1], 1 }

</bundles_post_ra>
